<compile_context>
chip_gen: v5e
topology: v5e:2x2
jax: 0.10.0
libtpu: 0.0.40
codegen_flags: <defaults>
</compile_context>

<pallas_src>
import jax
import jax.numpy as jnp
from jax import lax
from jax.experimental import pallas as pl
from jax.experimental.pallas import tpu as pltpu


def bilinear_relu_kernel(x1_ref, x2_ref, w_ref, bias_ref, o_ref, p_ref):
    """One (o-tile, b-tile) grid step.

    x1_ref  : (Tb, I)    f32   first input tile
    x2_ref  : (Tb, I)    f32   second input tile
    w_ref   : (To, I*I)  weight block in NATIVE (O, I*I) layout (streamed)
    bias_ref: (1,  To)   f32
    o_ref   : (Tb, To)   f32   output block
    p_ref   : (Tb, I*I)  VMEM scratch holding the outer product P
    """
    I = x1_ref.shape[1]
    x1 = x1_ref[...]
    x2 = x2_ref[...]

    # P[b, i*I + j] = x1[b, i] * x2[b, j].  Rebuilt fresh every grid step
    # (cheap VPU work, hidden under the (To, I*I) weight DMA + MXU pass), so
    # there is no cross-step scratch dependency and both grid axes stay
    # "parallel".
    # TODO(synk): for large I switch the static unroll to lax.fori_loop over
    # pl.ds lane slices.
    for i in range(I):
        p_ref[:, i * I:(i + 1) * I] = (x1[:, i:i + 1] * x2).astype(p_ref.dtype)

    # Single MXU pass: (Tb, I*I) x (To, I*I)^T, contraction K = I*I, f32 acc.
    y = lax.dot_general(
        p_ref[...], w_ref[...],
        dimension_numbers=(((1,), (1,)), ((), ())),
        preferred_element_type=jnp.float32,
    )
    y = y + bias_ref[...]
    o_ref[...] = jnp.maximum(y, 0.0).astype(o_ref.dtype)


def bilinear_layer(x1, x2, weight, bias, *, block_o=512, block_b=256):
    """x1, x2: (B, I); weight: (O, I, I); bias: (O,)  ->  (B, O) f32.

    block_o: O-tile width (multiple of 128; >=256 fills the v6e/v7x 256-wide
             MXU and amortizes per-step overhead).  Ignored when O <= block_o:
             the weight block then has the true O width (no zero padding of
             the dominant tensor).
    block_b: batch-tile cap; Tb = B when B <= block_b (single b-tile).
    """
    B, I = x1.shape
    O = weight.shape[0]
    K = I * I

    # --- O tiling (never pad the weight when a single block covers it) ------
    if O <= block_o:
        To, n_o, O_pad = O, 1, O
    else:
        To = block_o
        n_o = pl.cdiv(O, To)
        O_pad = n_o * To
        if O_pad != O:
            # Padding costs an extra pass over the weight; prefer O % block_o == 0.
            weight = jnp.pad(weight, ((0, O_pad - O), (0, 0), (0, 0)))
            bias = jnp.pad(bias, (0, O_pad - O))

    # --- B tiling ------------------------------------------------------------
    if B <= block_b:
        Tb, n_b, B_pad = B, 1, B
    else:
        Tb = block_b
        n_b = pl.cdiv(B, Tb)
        B_pad = n_b * Tb
        if B_pad != B:
            x1 = jnp.pad(x1, ((0, B_pad - B), (0, 0)))
            x2 = jnp.pad(x2, ((0, B_pad - B), (0, 0)))

    # Layout glue: reshaping contiguous trailing dims is free (no HBM pass).
    w2d = weight.reshape(O_pad, K)
    b2d = bias.astype(jnp.float32).reshape(1, O_pad)
    x1f = x1.astype(jnp.float32)
    x2f = x2.astype(jnp.float32)

    # o outer / b inner: the weight block index is constant across the inner
    # b sweep, so the dominant (To, K) stream is fetched exactly once per
    # o-tile regardless of how many b-tiles there are.
    grid = (n_o, n_b)

    cost = pl.CostEstimate(
        flops=2 * B_pad * O_pad * K + B_pad * K,
        transcendentals=0,
        bytes_accessed=(O_pad * K * w2d.dtype.itemsize
                        + 2 * B_pad * I * 4
                        + O_pad * 4
                        + B_pad * O_pad * 4),
    )

    out = pl.pallas_call(
        bilinear_relu_kernel,
        out_shape=jax.ShapeDtypeStruct((B_pad, O_pad), jnp.float32),
        grid_spec=pltpu.PrefetchScalarGridSpec(
            num_scalar_prefetch=0,
            grid=grid,
            in_specs=[
                pl.BlockSpec((Tb, I), lambda o, b: (b, 0)),    # x1
                pl.BlockSpec((Tb, I), lambda o, b: (b, 0)),    # x2
                pl.BlockSpec((To, K), lambda o, b: (o, 0)),    # weight (native)
                pl.BlockSpec((1, To), lambda o, b: (0, o)),    # bias
            ],
            out_specs=pl.BlockSpec((Tb, To), lambda o, b: (b, o)),
            scratch_shapes=[pltpu.VMEM((Tb, K), w2d.dtype)],   # P scratch
        ),
        compiler_params=pltpu.CompilerParams(
            # No cross-step state: both axes are independent, so megacore /
            # v7x's two TensorCores can shard either one.
            dimension_semantics=("parallel", "parallel"),
            # Blocks are small (<=2 MiB weight block at the defaults); 32 MiB
            # fits every generation's scoped VMEM, v7x's 64 MiB included.
            vmem_limit_bytes=32 * 1024 * 1024,
        ),
        cost_estimate=cost,
    )(x1f, x2f, w2d, b2d)

    if B_pad != B or O_pad != O:
        out = out[:B, :O]
    return out


if __name__ == "__main__":
    B, I, O = 8, 32, 16  # batch, input_shape, output_shape

    key = jax.random.PRNGKey(0)
    k1, k2, kw, kb = jax.random.split(key, 4)

    x1 = jax.random.normal(k1, (B, I), jnp.float32)
    x2 = jax.random.normal(k2, (B, I), jnp.float32)

    # nn.Bilinear default init: U(-1/sqrt(in1), 1/sqrt(in1)) for weight & bias.
    bound = 1.0 / jnp.sqrt(jnp.float32(I))
    weight = jax.random.uniform(kw, (O, I, I), jnp.float32, -bound, bound)
    bias = jax.random.uniform(kb, (O,), jnp.float32, -bound, bound)

    out = bilinear_layer(x1, x2, weight, bias)
    out = jax.block_until_ready(out)
    assert out.shape == (B, O)

    # Pure f32 reference (the kernel keeps both P and W in f32 now).
    ref = jnp.einsum("bi,oij,bj->bo", x1, weight, x2,
                     precision=lax.Precision.HIGHEST) + bias
    ref = jnp.maximum(ref, 0.0)
    max_err = jnp.max(jnp.abs(out - ref))
    assert jnp.allclose(out, ref, atol=1e-3, rtol=1e-3), \
        f"mismatch vs reference: {max_err}"

    print("KERNEL_OK")
</pallas_src>

<mosaic_0001>
module attributes {stable_mosaic.version = 11 : i64} {
  func.func @bilinear_relu_kernel(%arg0: i32, %arg1: i32, %arg2: memref<8x32xf32, #tpu.memory_space<vmem>>, %arg3: memref<8x32xf32, #tpu.memory_space<vmem>>, %arg4: memref<16x1024xf32, #tpu.memory_space<vmem>>, %arg5: memref<1x16xf32, #tpu.memory_space<vmem>>, %arg6: memref<8x16xf32, #tpu.memory_space<vmem>>, %arg7: memref<8x1024xf32, #tpu.memory_space<vmem>>) attributes {dimension_semantics = [#tpu.dimension_semantics<parallel>, #tpu.dimension_semantics<parallel>], iteration_bounds = array<i64: 1, 1>, scalar_prefetch = 0 : i64, scratch_operands = 1 : i64, tpu.core_type = #tpu.core_type<tc>, window_params = [{transform_indices = @transform_0, window_bounds = array<i64: 8, 32>}, {transform_indices = @transform_1, window_bounds = array<i64: 8, 32>}, {transform_indices = @transform_2, window_bounds = array<i64: 16, 1024>}, {transform_indices = @transform_3, window_bounds = array<i64: 1, 16>}, {transform_indices = @transform_4, window_bounds = array<i64: 8, 16>}]} {
    %c0 = arith.constant 0 : index
    %c0_0 = arith.constant 0 : index
    %0 = vector.load %arg2[%c0, %c0_0] : memref<8x32xf32, #tpu.memory_space<vmem>>, vector<8x32xf32>
    %c0_1 = arith.constant 0 : index
    %c0_2 = arith.constant 0 : index
    %1 = vector.load %arg3[%c0_1, %c0_2] : memref<8x32xf32, #tpu.memory_space<vmem>>, vector<8x32xf32>
    %2 = vector.extract_strided_slice %0 {offsets = [0, 0], sizes = [8, 1], strides = [1, 1]} : vector<8x32xf32> to vector<8x1xf32>
    %3 = vector.broadcast %2 : vector<8x1xf32> to vector<8x32xf32>
    %4 = arith.mulf %3, %1 : vector<8x32xf32>
    %c0_3 = arith.constant 0 : index
    %c0_4 = arith.constant 0 : index
    %5 = vector.load %arg7[%c0_3, %c0_4] : memref<8x1024xf32, #tpu.memory_space<vmem>>, vector<8x32xf32>
    tpu.vector_store %arg7[%c0_3, %c0_4], %4 {strides = array<i32>} : memref<8x1024xf32, #tpu.memory_space<vmem>>, vector<8x32xf32>,
    %6 = vector.extract_strided_slice %0 {offsets = [0, 1], sizes = [8, 1], strides = [1, 1]} : vector<8x32xf32> to vector<8x1xf32>
    %7 = vector.broadcast %6 : vector<8x1xf32> to vector<8x32xf32>
    %8 = arith.mulf %7, %1 : vector<8x32xf32>
    %c0_5 = arith.constant 0 : index
    %c32 = arith.constant 32 : index
    %9 = vector.load %arg7[%c0_5, %c32] : memref<8x1024xf32, #tpu.memory_space<vmem>>, vector<8x32xf32>
    tpu.vector_store %arg7[%c0_5, %c32], %8 {strides = array<i32>} : memref<8x1024xf32, #tpu.memory_space<vmem>>, vector<8x32xf32>,
    %10 = vector.extract_strided_slice %0 {offsets = [0, 2], sizes = [8, 1], strides = [1, 1]} : vector<8x32xf32> to vector<8x1xf32>
    %11 = vector.broadcast %10 : vector<8x1xf32> to vector<8x32xf32>
    %12 = arith.mulf %11, %1 : vector<8x32xf32>
    %c0_6 = arith.constant 0 : index
    %c64 = arith.constant 64 : index
    %13 = vector.load %arg7[%c0_6, %c64] : memref<8x1024xf32, #tpu.memory_space<vmem>>, vector<8x32xf32>
    tpu.vector_store %arg7[%c0_6, %c64], %12 {strides = array<i32>} : memref<8x1024xf32, #tpu.memory_space<vmem>>, vector<8x32xf32>,
    %14 = vector.extract_strided_slice %0 {offsets = [0, 3], sizes = [8, 1], strides = [1, 1]} : vector<8x32xf32> to vector<8x1xf32>
    %15 = vector.broadcast %14 : vector<8x1xf32> to vector<8x32xf32>
    %16 = arith.mulf %15, %1 : vector<8x32xf32>
    %c0_7 = arith.constant 0 : index
    %c96 = arith.constant 96 : index
    %17 = vector.load %arg7[%c0_7, %c96] : memref<8x1024xf32, #tpu.memory_space<vmem>>, vector<8x32xf32>
    tpu.vector_store %arg7[%c0_7, %c96], %16 {strides = array<i32>} : memref<8x1024xf32, #tpu.memory_space<vmem>>, vector<8x32xf32>,
    %18 = vector.extract_strided_slice %0 {offsets = [0, 4], sizes = [8, 1], strides = [1, 1]} : vector<8x32xf32> to vector<8x1xf32>
    %19 = vector.broadcast %18 : vector<8x1xf32> to vector<8x32xf32>
    %20 = arith.mulf %19, %1 : vector<8x32xf32>
    %c0_8 = arith.constant 0 : index
    %c128 = arith.constant 128 : index
    %21 = vector.load %arg7[%c0_8, %c128] : memref<8x1024xf32, #tpu.memory_space<vmem>>, vector<8x32xf32>
    tpu.vector_store %arg7[%c0_8, %c128], %20 {strides = array<i32>} : memref<8x1024xf32, #tpu.memory_space<vmem>>, vector<8x32xf32>,
    %22 = vector.extract_strided_slice %0 {offsets = [0, 5], sizes = [8, 1], strides = [1, 1]} : vector<8x32xf32> to vector<8x1xf32>
    %23 = vector.broadcast %22 : vector<8x1xf32> to vector<8x32xf32>
    %24 = arith.mulf %23, %1 : vector<8x32xf32>
    %c0_9 = arith.constant 0 : index
    %c160 = arith.constant 160 : index
    %25 = vector.load %arg7[%c0_9, %c160] : memref<8x1024xf32, #tpu.memory_space<vmem>>, vector<8x32xf32>
    tpu.vector_store %arg7[%c0_9, %c160], %24 {strides = array<i32>} : memref<8x1024xf32, #tpu.memory_space<vmem>>, vector<8x32xf32>,
    %26 = vector.extract_strided_slice %0 {offsets = [0, 6], sizes = [8, 1], strides = [1, 1]} : vector<8x32xf32> to vector<8x1xf32>
    %27 = vector.broadcast %26 : vector<8x1xf32> to vector<8x32xf32>
    %28 = arith.mulf %27, %1 : vector<8x32xf32>
    %c0_10 = arith.constant 0 : index
    %c192 = arith.constant 192 : index
    %29 = vector.load %arg7[%c0_10, %c192] : memref<8x1024xf32, #tpu.memory_space<vmem>>, vector<8x32xf32>
    tpu.vector_store %arg7[%c0_10, %c192], %28 {strides = array<i32>} : memref<8x1024xf32, #tpu.memory_space<vmem>>, vector<8x32xf32>,
    %30 = vector.extract_strided_slice %0 {offsets = [0, 7], sizes = [8, 1], strides = [1, 1]} : vector<8x32xf32> to vector<8x1xf32>
    %31 = vector.broadcast %30 : vector<8x1xf32> to vector<8x32xf32>
    %32 = arith.mulf %31, %1 : vector<8x32xf32>
    %c0_11 = arith.constant 0 : index
    %c224 = arith.constant 224 : index
    %33 = vector.load %arg7[%c0_11, %c224] : memref<8x1024xf32, #tpu.memory_space<vmem>>, vector<8x32xf32>
    tpu.vector_store %arg7[%c0_11, %c224], %32 {strides = array<i32>} : memref<8x1024xf32, #tpu.memory_space<vmem>>, vector<8x32xf32>,
    %34 = vector.extract_strided_slice %0 {offsets = [0, 8], sizes = [8, 1], strides = [1, 1]} : vector<8x32xf32> to vector<8x1xf32>
    %35 = vector.broadcast %34 : vector<8x1xf32> to vector<8x32xf32>
    %36 = arith.mulf %35, %1 : vector<8x32xf32>
    %c0_12 = arith.constant 0 : index
    %c256 = arith.constant 256 : index
    %37 = vector.load %arg7[%c0_12, %c256] : memref<8x1024xf32, #tpu.memory_space<vmem>>, vector<8x32xf32>
    tpu.vector_store %arg7[%c0_12, %c256], %36 {strides = array<i32>} : memref<8x1024xf32, #tpu.memory_space<vmem>>, vector<8x32xf32>,
    %38 = vector.extract_strided_slice %0 {offsets = [0, 9], sizes = [8, 1], strides = [1, 1]} : vector<8x32xf32> to vector<8x1xf32>
    %39 = vector.broadcast %38 : vector<8x1xf32> to vector<8x32xf32>
    %40 = arith.mulf %39, %1 : vector<8x32xf32>
    %c0_13 = arith.constant 0 : index
    %c288 = arith.constant 288 : index
    %41 = vector.load %arg7[%c0_13, %c288] : memref<8x1024xf32, #tpu.memory_space<vmem>>, vector<8x32xf32>
    tpu.vector_store %arg7[%c0_13, %c288], %40 {strides = array<i32>} : memref<8x1024xf32, #tpu.memory_space<vmem>>, vector<8x32xf32>,
    %42 = vector.extract_strided_slice %0 {offsets = [0, 10], sizes = [8, 1], strides = [1, 1]} : vector<8x32xf32> to vector<8x1xf32>
    %43 = vector.broadcast %42 : vector<8x1xf32> to vector<8x32xf32>
    %44 = arith.mulf %43, %1 : vector<8x32xf32>
    %c0_14 = arith.constant 0 : index
    %c320 = arith.constant 320 : index
    %45 = vector.load %arg7[%c0_14, %c320] : memref<8x1024xf32, #tpu.memory_space<vmem>>, vector<8x32xf32>
    tpu.vector_store %arg7[%c0_14, %c320], %44 {strides = array<i32>} : memref<8x1024xf32, #tpu.memory_space<vmem>>, vector<8x32xf32>,
    %46 = vector.extract_strided_slice %0 {offsets = [0, 11], sizes = [8, 1], strides = [1, 1]} : vector<8x32xf32> to vector<8x1xf32>
    %47 = vector.broadcast %46 : vector<8x1xf32> to vector<8x32xf32>
    %48 = arith.mulf %47, %1 : vector<8x32xf32>
    %c0_15 = arith.constant 0 : index
    %c352 = arith.constant 352 : index
    %49 = vector.load %arg7[%c0_15, %c352] : memref<8x1024xf32, #tpu.memory_space<vmem>>, vector<8x32xf32>
    tpu.vector_store %arg7[%c0_15, %c352], %48 {strides = array<i32>} : memref<8x1024xf32, #tpu.memory_space<vmem>>, vector<8x32xf32>,
    %50 = vector.extract_strided_slice %0 {offsets = [0, 12], sizes = [8, 1], strides = [1, 1]} : vector<8x32xf32> to vector<8x1xf32>
    %51 = vector.broadcast %50 : vector<8x1xf32> to vector<8x32xf32>
    %52 = arith.mulf %51, %1 : vector<8x32xf32>
    %c0_16 = arith.constant 0 : index
    %c384 = arith.constant 384 : index
    %53 = vector.load %arg7[%c0_16, %c384] : memref<8x1024xf32, #tpu.memory_space<vmem>>, vector<8x32xf32>
    tpu.vector_store %arg7[%c0_16, %c384], %52 {strides = array<i32>} : memref<8x1024xf32, #tpu.memory_space<vmem>>, vector<8x32xf32>,
    %54 = vector.extract_strided_slice %0 {offsets = [0, 13], sizes = [8, 1], strides = [1, 1]} : vector<8x32xf32> to vector<8x1xf32>
    %55 = vector.broadcast %54 : vector<8x1xf32> to vector<8x32xf32>
    %56 = arith.mulf %55, %1 : vector<8x32xf32>
    %c0_17 = arith.constant 0 : index
    %c416 = arith.constant 416 : index
    %57 = vector.load %arg7[%c0_17, %c416] : memref<8x1024xf32, #tpu.memory_space<vmem>>, vector<8x32xf32>
    tpu.vector_store %arg7[%c0_17, %c416], %56 {strides = array<i32>} : memref<8x1024xf32, #tpu.memory_space<vmem>>, vector<8x32xf32>,
    %58 = vector.extract_strided_slice %0 {offsets = [0, 14], sizes = [8, 1], strides = [1, 1]} : vector<8x32xf32> to vector<8x1xf32>
    %59 = vector.broadcast %58 : vector<8x1xf32> to vector<8x32xf32>
    %60 = arith.mulf %59, %1 : vector<8x32xf32>
    %c0_18 = arith.constant 0 : index
    %c448 = arith.constant 448 : index
    %61 = vector.load %arg7[%c0_18, %c448] : memref<8x1024xf32, #tpu.memory_space<vmem>>, vector<8x32xf32>
    tpu.vector_store %arg7[%c0_18, %c448], %60 {strides = array<i32>} : memref<8x1024xf32, #tpu.memory_space<vmem>>, vector<8x32xf32>,
    %62 = vector.extract_strided_slice %0 {offsets = [0, 15], sizes = [8, 1], strides = [1, 1]} : vector<8x32xf32> to vector<8x1xf32>
    %63 = vector.broadcast %62 : vector<8x1xf32> to vector<8x32xf32>
    %64 = arith.mulf %63, %1 : vector<8x32xf32>
    %c0_19 = arith.constant 0 : index
    %c480 = arith.constant 480 : index
    %65 = vector.load %arg7[%c0_19, %c480] : memref<8x1024xf32, #tpu.memory_space<vmem>>, vector<8x32xf32>
    tpu.vector_store %arg7[%c0_19, %c480], %64 {strides = array<i32>} : memref<8x1024xf32, #tpu.memory_space<vmem>>, vector<8x32xf32>,
    %66 = vector.extract_strided_slice %0 {offsets = [0, 16], sizes = [8, 1], strides = [1, 1]} : vector<8x32xf32> to vector<8x1xf32>
    %67 = vector.broadcast %66 : vector<8x1xf32> to vector<8x32xf32>
    %68 = arith.mulf %67, %1 : vector<8x32xf32>
    %c0_20 = arith.constant 0 : index
    %c512 = arith.constant 512 : index
    %69 = vector.load %arg7[%c0_20, %c512] : memref<8x1024xf32, #tpu.memory_space<vmem>>, vector<8x32xf32>
    tpu.vector_store %arg7[%c0_20, %c512], %68 {strides = array<i32>} : memref<8x1024xf32, #tpu.memory_space<vmem>>, vector<8x32xf32>,
    %70 = vector.extract_strided_slice %0 {offsets = [0, 17], sizes = [8, 1], strides = [1, 1]} : vector<8x32xf32> to vector<8x1xf32>
    %71 = vector.broadcast %70 : vector<8x1xf32> to vector<8x32xf32>
    %72 = arith.mulf %71, %1 : vector<8x32xf32>
    %c0_21 = arith.constant 0 : index
    %c544 = arith.constant 544 : index
    %73 = vector.load %arg7[%c0_21, %c544] : memref<8x1024xf32, #tpu.memory_space<vmem>>, vector<8x32xf32>
    tpu.vector_store %arg7[%c0_21, %c544], %72 {strides = array<i32>} : memref<8x1024xf32, #tpu.memory_space<vmem>>, vector<8x32xf32>,
    %74 = vector.extract_strided_slice %0 {offsets = [0, 18], sizes = [8, 1], strides = [1, 1]} : vector<8x32xf32> to vector<8x1xf32>
    %75 = vector.broadcast %74 : vector<8x1xf32> to vector<8x32xf32>
    %76 = arith.mulf %75, %1 : vector<8x32xf32>
    %c0_22 = arith.constant 0 : index
    %c576 = arith.constant 576 : index
    %77 = vector.load %arg7[%c0_22, %c576] : memref<8x1024xf32, #tpu.memory_space<vmem>>, vector<8x32xf32>
    tpu.vector_store %arg7[%c0_22, %c576], %76 {strides = array<i32>} : memref<8x1024xf32, #tpu.memory_space<vmem>>, vector<8x32xf32>,
    %78 = vector.extract_strided_slice %0 {offsets = [0, 19], sizes = [8, 1], strides = [1, 1]} : vector<8x32xf32> to vector<8x1xf32>
    %79 = vector.broadcast %78 : vector<8x1xf32> to vector<8x32xf32>
    %80 = arith.mulf %79, %1 : vector<8x32xf32>
    %c0_23 = arith.constant 0 : index
    %c608 = arith.constant 608 : index
    %81 = vector.load %arg7[%c0_23, %c608] : memref<8x1024xf32, #tpu.memory_space<vmem>>, vector<8x32xf32>
    tpu.vector_store %arg7[%c0_23, %c608], %80 {strides = array<i32>} : memref<8x1024xf32, #tpu.memory_space<vmem>>, vector<8x32xf32>,
    %82 = vector.extract_strided_slice %0 {offsets = [0, 20], sizes = [8, 1], strides = [1, 1]} : vector<8x32xf32> to vector<8x1xf32>
    %83 = vector.broadcast %82 : vector<8x1xf32> to vector<8x32xf32>
    %84 = arith.mulf %83, %1 : vector<8x32xf32>
    %c0_24 = arith.constant 0 : index
    %c640 = arith.constant 640 : index
    %85 = vector.load %arg7[%c0_24, %c640] : memref<8x1024xf32, #tpu.memory_space<vmem>>, vector<8x32xf32>
    tpu.vector_store %arg7[%c0_24, %c640], %84 {strides = array<i32>} : memref<8x1024xf32, #tpu.memory_space<vmem>>, vector<8x32xf32>,
    %86 = vector.extract_strided_slice %0 {offsets = [0, 21], sizes = [8, 1], strides = [1, 1]} : vector<8x32xf32> to vector<8x1xf32>
    %87 = vector.broadcast %86 : vector<8x1xf32> to vector<8x32xf32>
    %88 = arith.mulf %87, %1 : vector<8x32xf32>
    %c0_25 = arith.constant 0 : index
    %c672 = arith.constant 672 : index
    %89 = vector.load %arg7[%c0_25, %c672] : memref<8x1024xf32, #tpu.memory_space<vmem>>, vector<8x32xf32>
    tpu.vector_store %arg7[%c0_25, %c672], %88 {strides = array<i32>} : memref<8x1024xf32, #tpu.memory_space<vmem>>, vector<8x32xf32>,
    %90 = vector.extract_strided_slice %0 {offsets = [0, 22], sizes = [8, 1], strides = [1, 1]} : vector<8x32xf32> to vector<8x1xf32>
    %91 = vector.broadcast %90 : vector<8x1xf32> to vector<8x32xf32>
    %92 = arith.mulf %91, %1 : vector<8x32xf32>
    %c0_26 = arith.constant 0 : index
    %c704 = arith.constant 704 : index
    %93 = vector.load %arg7[%c0_26, %c704] : memref<8x1024xf32, #tpu.memory_space<vmem>>, vector<8x32xf32>
    tpu.vector_store %arg7[%c0_26, %c704], %92 {strides = array<i32>} : memref<8x1024xf32, #tpu.memory_space<vmem>>, vector<8x32xf32>,
    %94 = vector.extract_strided_slice %0 {offsets = [0, 23], sizes = [8, 1], strides = [1, 1]} : vector<8x32xf32> to vector<8x1xf32>
    %95 = vector.broadcast %94 : vector<8x1xf32> to vector<8x32xf32>
    %96 = arith.mulf %95, %1 : vector<8x32xf32>
    %c0_27 = arith.constant 0 : index
    %c736 = arith.constant 736 : index
    %97 = vector.load %arg7[%c0_27, %c736] : memref<8x1024xf32, #tpu.memory_space<vmem>>, vector<8x32xf32>
    tpu.vector_store %arg7[%c0_27, %c736], %96 {strides = array<i32>} : memref<8x1024xf32, #tpu.memory_space<vmem>>, vector<8x32xf32>,
    %98 = vector.extract_strided_slice %0 {offsets = [0, 24], sizes = [8, 1], strides = [1, 1]} : vector<8x32xf32> to vector<8x1xf32>
    %99 = vector.broadcast %98 : vector<8x1xf32> to vector<8x32xf32>
    %100 = arith.mulf %99, %1 : vector<8x32xf32>
    %c0_28 = arith.constant 0 : index
    %c768 = arith.constant 768 : index
    %101 = vector.load %arg7[%c0_28, %c768] : memref<8x1024xf32, #tpu.memory_space<vmem>>, vector<8x32xf32>
    tpu.vector_store %arg7[%c0_28, %c768], %100 {strides = array<i32>} : memref<8x1024xf32, #tpu.memory_space<vmem>>, vector<8x32xf32>,
    %102 = vector.extract_strided_slice %0 {offsets = [0, 25], sizes = [8, 1], strides = [1, 1]} : vector<8x32xf32> to vector<8x1xf32>
    %103 = vector.broadcast %102 : vector<8x1xf32> to vector<8x32xf32>
    %104 = arith.mulf %103, %1 : vector<8x32xf32>
    %c0_29 = arith.constant 0 : index
    %c800 = arith.constant 800 : index
    %105 = vector.load %arg7[%c0_29, %c800] : memref<8x1024xf32, #tpu.memory_space<vmem>>, vector<8x32xf32>
    tpu.vector_store %arg7[%c0_29, %c800], %104 {strides = array<i32>} : memref<8x1024xf32, #tpu.memory_space<vmem>>, vector<8x32xf32>,
    %106 = vector.extract_strided_slice %0 {offsets = [0, 26], sizes = [8, 1], strides = [1, 1]} : vector<8x32xf32> to vector<8x1xf32>
    %107 = vector.broadcast %106 : vector<8x1xf32> to vector<8x32xf32>
    %108 = arith.mulf %107, %1 : vector<8x32xf32>
    %c0_30 = arith.constant 0 : index
    %c832 = arith.constant 832 : index
    %109 = vector.load %arg7[%c0_30, %c832] : memref<8x1024xf32, #tpu.memory_space<vmem>>, vector<8x32xf32>
    tpu.vector_store %arg7[%c0_30, %c832], %108 {strides = array<i32>} : memref<8x1024xf32, #tpu.memory_space<vmem>>, vector<8x32xf32>,
    %110 = vector.extract_strided_slice %0 {offsets = [0, 27], sizes = [8, 1], strides = [1, 1]} : vector<8x32xf32> to vector<8x1xf32>
    %111 = vector.broadcast %110 : vector<8x1xf32> to vector<8x32xf32>
    %112 = arith.mulf %111, %1 : vector<8x32xf32>
    %c0_31 = arith.constant 0 : index
    %c864 = arith.constant 864 : index
    %113 = vector.load %arg7[%c0_31, %c864] : memref<8x1024xf32, #tpu.memory_space<vmem>>, vector<8x32xf32>
    tpu.vector_store %arg7[%c0_31, %c864], %112 {strides = array<i32>} : memref<8x1024xf32, #tpu.memory_space<vmem>>, vector<8x32xf32>,
    %114 = vector.extract_strided_slice %0 {offsets = [0, 28], sizes = [8, 1], strides = [1, 1]} : vector<8x32xf32> to vector<8x1xf32>
    %115 = vector.broadcast %114 : vector<8x1xf32> to vector<8x32xf32>
    %116 = arith.mulf %115, %1 : vector<8x32xf32>
    %c0_32 = arith.constant 0 : index
    %c896 = arith.constant 896 : index
    %117 = vector.load %arg7[%c0_32, %c896] : memref<8x1024xf32, #tpu.memory_space<vmem>>, vector<8x32xf32>
    tpu.vector_store %arg7[%c0_32, %c896], %116 {strides = array<i32>} : memref<8x1024xf32, #tpu.memory_space<vmem>>, vector<8x32xf32>,
    %118 = vector.extract_strided_slice %0 {offsets = [0, 29], sizes = [8, 1], strides = [1, 1]} : vector<8x32xf32> to vector<8x1xf32>
    %119 = vector.broadcast %118 : vector<8x1xf32> to vector<8x32xf32>
    %120 = arith.mulf %119, %1 : vector<8x32xf32>
    %c0_33 = arith.constant 0 : index
    %c928 = arith.constant 928 : index
    %121 = vector.load %arg7[%c0_33, %c928] : memref<8x1024xf32, #tpu.memory_space<vmem>>, vector<8x32xf32>
    tpu.vector_store %arg7[%c0_33, %c928], %120 {strides = array<i32>} : memref<8x1024xf32, #tpu.memory_space<vmem>>, vector<8x32xf32>,
    %122 = vector.extract_strided_slice %0 {offsets = [0, 30], sizes = [8, 1], strides = [1, 1]} : vector<8x32xf32> to vector<8x1xf32>
    %123 = vector.broadcast %122 : vector<8x1xf32> to vector<8x32xf32>
    %124 = arith.mulf %123, %1 : vector<8x32xf32>
    %c0_34 = arith.constant 0 : index
    %c960 = arith.constant 960 : index
    %125 = vector.load %arg7[%c0_34, %c960] : memref<8x1024xf32, #tpu.memory_space<vmem>>, vector<8x32xf32>
    tpu.vector_store %arg7[%c0_34, %c960], %124 {strides = array<i32>} : memref<8x1024xf32, #tpu.memory_space<vmem>>, vector<8x32xf32>,
    %126 = vector.extract_strided_slice %0 {offsets = [0, 31], sizes = [8, 1], strides = [1, 1]} : vector<8x32xf32> to vector<8x1xf32>
    %127 = vector.broadcast %126 : vector<8x1xf32> to vector<8x32xf32>
    %128 = arith.mulf %127, %1 : vector<8x32xf32>
    %c0_35 = arith.constant 0 : index
    %c992 = arith.constant 992 : index
    %129 = vector.load %arg7[%c0_35, %c992] : memref<8x1024xf32, #tpu.memory_space<vmem>>, vector<8x32xf32>
    tpu.vector_store %arg7[%c0_35, %c992], %128 {strides = array<i32>} : memref<8x1024xf32, #tpu.memory_space<vmem>>, vector<8x32xf32>,
    %c0_36 = arith.constant 0 : index
    %c0_37 = arith.constant 0 : index
    %130 = vector.load %arg7[%c0_36, %c0_37] : memref<8x1024xf32, #tpu.memory_space<vmem>>, vector<8x1024xf32>
    %c0_38 = arith.constant 0 : index
    %c0_39 = arith.constant 0 : index
    %131 = vector.load %arg4[%c0_38, %c0_39] : memref<16x1024xf32, #tpu.memory_space<vmem>>, vector<16x1024xf32>
    %cst = arith.constant dense<0.000000e+00> : vector<8x16xf32>
    %132 = tpu.matmul %130, %131, %cst {dimension_numbers = #tpu.dot_dimension_numbers<[1], [1], [0], [0], [0, 0, 1, 0], [], []>} : vector<8x1024xf32>, vector<16x1024xf32>, vector<8x16xf32> -> vector<8x16xf32>
    %c0_40 = arith.constant 0 : index
    %c0_41 = arith.constant 0 : index
    %133 = vector.load %arg5[%c0_40, %c0_41] : memref<1x16xf32, #tpu.memory_space<vmem>>, vector<1x16xf32>
    %134 = vector.broadcast %133 : vector<1x16xf32> to vector<8x16xf32>
    %135 = arith.addf %132, %134 : vector<8x16xf32>
    %cst_42 = arith.constant 0.000000e+00 : f32
    %136 = vector.broadcast %cst_42 : f32 to vector<8x16xf32>
    %137 = arith.maximumf %135, %136 : vector<8x16xf32>
    %c0_43 = arith.constant 0 : index
    %c0_44 = arith.constant 0 : index
    %138 = vector.load %arg6[%c0_43, %c0_44] : memref<8x16xf32, #tpu.memory_space<vmem>>, vector<8x16xf32>
    tpu.vector_store %arg6[%c0_43, %c0_44], %137 {strides = array<i32>} : memref<8x16xf32, #tpu.memory_space<vmem>>, vector<8x16xf32>,
    return
  }
  func.func @transform_0(%arg0: i32, %arg1: i32) -> (i32, i32) {
    %c0_i32 = arith.constant 0 : i32
    %c0_i32_0 = arith.constant 0 : i32
    return %arg1, %c0_i32 : i32, i32
  }
  func.func @transform_1(%arg0: i32, %arg1: i32) -> (i32, i32) {
    %c0_i32 = arith.constant 0 : i32
    %c0_i32_0 = arith.constant 0 : i32
    return %arg1, %c0_i32 : i32, i32
  }
  func.func @transform_2(%arg0: i32, %arg1: i32) -> (i32, i32) {
    %c0_i32 = arith.constant 0 : i32
    %c0_i32_0 = arith.constant 0 : i32
    return %arg0, %c0_i32 : i32, i32
  }
  func.func @transform_3(%arg0: i32, %arg1: i32) -> (i32, i32) {
    %c0_i32 = arith.constant 0 : i32
    %c0_i32_0 = arith.constant 0 : i32
    return %c0_i32, %arg0 : i32, i32
  }
  func.func @transform_4(%arg0: i32, %arg1: i32) -> (i32, i32) {
    %c0_i32 = arith.constant 0 : i32
    return %arg1, %arg0 : i32, i32
  }
}

</mosaic_0001>

<bundles_post_ra>
// kernel: tpu_custom_call.1
= control target key start
LH: loop header
LB: loop body
LE: loop exit
PB: predicated region body
PF: predicated region fallthrough
CT: control target
= control target key end

     0   :  { %9 = vsyncpa [#allocation4], 0  ;;  %s948_s0 = inlined_call_operand.hbm [shape: f32[8,32], index: 0, kind: input, shape index: {}]   ;;  %s949_s1 = inlined_call_operand.hbm [shape: f32[8,32], index: 1, kind: input, shape index: {}]   ;;  %s950_s2 = inlined_call_operand.hbm [shape: f32[16,1024], index: 2, kind: input, shape index: {}]   ;;  %s951_s3 = inlined_call_operand.vmem [shape: f32[1,16], index: 3, kind: input, shape index: {}]   ;;  %s952_s4 = inlined_call_operand.hbm [shape: f32[8,16], index: 4, kind: output, shape index: {}]  }
   0x1   :  { %10 = vsyncpa [#allocation7], 0  ;;  %s28_s17 = sshll.u32 %s949_s1, 4  ;;  %s29_s17 = int_to_ptr.hbm [resolvable:$true] %s28_s17 }
   0x2   :  { %11 = vsyncpa [#allocation5], 0  ;;  %s741_s18 = smov [#allocation6]   ;;  %s17_s22 = sshll.u32 %s948_s0, 4  ;;  %s18_s22 = int_to_ptr.hbm [resolvable:$true] %s17_s22 }
   0x3   :  { %s30_s19 = sshll.u32 %s741_s18, 4  ;;  %s742_s23 = smov [#allocation3]   ;;  %s31_s19 = int_to_ptr.vmem [resolvable:$true] %s30_s19 }
   0x4   :  { %33 = dma.hbm_to_vmem [thread:$0]  %s29_s17, 128, %s31_s19, [#allocation7]  }
   0x5   :  { %s19_s24 = sshll.u32 %s742_s23, 4  ;;  %s38_s27 = sshll.u32 %s950_s2, 4  ;;  %s20_s24 = int_to_ptr.vmem [resolvable:$true] %s19_s24  ;;  %s39_s27 = int_to_ptr.hbm [resolvable:$true] %s38_s27 }
   0x6   :  { %22 = dma.hbm_to_vmem [thread:$0]  %s18_s22, 128, %s20_s24, [#allocation4]  }
   0x7   :  { %s743_s1 = smov [#allocation8]   ;;  %s744_s29 = smov 1024  }
   0x8   :  { %s40_s28 = sshll.u32 %s743_s1, 4  ;;  %s745_s30 = smov 64   ;;  %s41_s28 = int_to_ptr.vmem [resolvable:$true] %s40_s28 }
   0x9   :  { %46 = dma.hbm_to_vmem [thread:$0]  %s39_s27, 2048, %s41_s28, [#allocation7], %s744_s29, %s744_s29, %s745_s30  }
   0xa   :  { %735 = dma.done.wait [#allocation4], 128  }
   0xb   :  { %736 = vsyncadd [#allocation4], 4294967168 }
   0xc   :  { %737 = dma.done.wait [#allocation7], 2176  }
   0xd   :  { %738 = vsyncadd [#allocation7], 4294965120  ;;  %v746_v0 = vmov 2   ;;  %v747_v1 = vmov 0   ;;  %v748_v2 = vmov 3   ;;  %v816_v3 = vld [vmem:[#allocation3] sm:$0xff] }
   0xe   :  { %607 = vset.pattern.permute.xlu1 %v746_v0  ;;  %605 = vset.pattern.permute.xlu0 %v747_v1  ;;  %v749_v4 = vmov 9   ;;  %v750_v5 = vmov 1   ;;  %v751_v6 = vmov 10   ;;  %v752_v7 = vmov 13   ;;  %v847_v32 = vld [vmem:[#allocation6] sm:$0xff]  ;;  %s776_s0 = smov 32  }
   0xf   :  { %608 = vset.pattern.permute.xlu2 %v748_v2  ;;  %83 = vperm.xlu1 %607, %v816_v3   ;;  %v753_v8 = vmov 11   ;;  %v754_v9 = vmov 14   ;;  %v755_v10 = vmov 5   ;;  %v756_v11 = vmov 6   ;;  %s777_s2 = smov 96   ;;  %s780_s7 = smov [#allocation9]  }
  0x10   :  { %65 = vperm.xlu0 %605, %v816_v3   ;;  %94 = vperm.xlu2 %608, %v816_v3   ;;  %v757_v12 = vmov 15   ;;  %v758_v13 = vmov 7   ;;  %v759_v14 = vmov 27   ;;  %v760_v15 = vmov 25   ;;  %s552_s8 = sshll.u32 %s780_s7, 4  ;;  %s553_s8 = int_to_ptr.vmem [resolvable:$true] %s552_s8 }
  0x11   :  { %v761_v16 = vmov 26   ;;  %v762_v17 = vmov 21   ;;  %v763_v18 = vmov 17   ;;  %v764_v19 = vmov 29  }
  0x12   :  { %v765_v20 = vmov 18   ;;  %v766_v21 = vmov 30   ;;  %v767_v22 = vmov 19   ;;  %v768_v23 = vmov 31  }
  0x13   :  { %v769_v24 = vmov 22   ;;  %v770_v25 = vmov 23   ;;  %v771_v26 = vmov 8   ;;  %v772_v27 = vmov 4  }
  0x14   :  { %v773_v29 = vmov 12   ;;  %v774_v33 = vmov 16   ;;  %vm69_vm0 = vcmask 261120   ;;  %v775_v39 = vmov 24  }
  0x15   :  { %v778_v50 = vmov 28   ;;  %v779_v63 = vmov 20   ;;  %vm80_vm1 = vcmask 523520   ;;  %vm91_vm2 = vcmask 785920  }
  0x16   :  { %vm102_vm3 = vcmask 1048320   ;;  %vm545_vm4 = vcmask 130048  }
  0x17   :  { %609 = vset.pattern.permute.xlu1 %v749_v4 }
  0x18   :  { %606 = vset.pattern.permute.xlu0 %v750_v5  ;;  %147 = vperm.xlu1 %609, %v816_v3  }
  0x19   :  { %72 = vperm.xlu0 %606, %v816_v3   ;;  %610 = vset.pattern.permute.xlu2 %v751_v6 }
  0x1a   :  { %157 = vperm.xlu2 %610, %v816_v3  }
  0x20   :  { %612 = vset.pattern.permute.xlu1 %v752_v7 }
  0x21   :  { %611 = vset.pattern.permute.xlu0 %v753_v8  ;;  %183 = vperm.xlu1 %612, %v816_v3  }
  0x22   :  { %167 = vperm.xlu0 %611, %v816_v3   ;;  %613 = vset.pattern.permute.xlu2 %v754_v9 }
  0x23   :  { %193 = vperm.xlu2 %613, %v816_v3  }
  0x29   :  { %614 = vset.pattern.permute.xlu1 %v755_v10 }
  0x2a   :  { %616 = vset.pattern.permute.xlu0 %v756_v11  ;;  %111 = vperm.xlu1 %614, %v816_v3  }
  0x2b   :  { %121 = vperm.xlu0 %616, %v816_v3   ;;  %615 = vset.pattern.permute.xlu2 %v757_v12 }
  0x2c   :  { %203 = vperm.xlu2 %615, %v816_v3  }
  0x32   :  { %617 = vset.pattern.permute.xlu1 %v758_v13 }
  0x33   :  { %621 = vset.pattern.permute.xlu0 %v759_v14  ;;  %131 = vperm.xlu1 %617, %v816_v3  }
  0x34   :  { %311 = vperm.xlu0 %621, %v816_v3   ;;  %618 = vset.pattern.permute.xlu2 %v760_v15 }
  0x35   :  { %291 = vperm.xlu2 %618, %v816_v3  }
  0x3b   :  { %619 = vset.pattern.permute.xlu1 %v761_v16 }
  0x3c   :  { %626 = vset.pattern.permute.xlu0 %v762_v17  ;;  %301 = vperm.xlu1 %619, %v816_v3  }
  0x3d   :  { %255 = vperm.xlu0 %626, %v816_v3   ;;  %620 = vset.pattern.permute.xlu2 %v763_v18 }
  0x3e   :  { %219 = vperm.xlu2 %620, %v816_v3  }
  0x44   :  { %622 = vset.pattern.permute.xlu1 %v764_v19 }
  0x45   :  { %327 = vperm.xlu1 %622, %v816_v3   ;;  %631 = vset.pattern.permute.xlu0 %v773_v29 }
  0x46   :  { %623 = vset.pattern.permute.xlu2 %v765_v20  ;;  %177 = vperm.xlu0 %631, %v816_v3  }
  0x47   :  { %229 = vperm.xlu2 %623, %v816_v3  }
  0x4d   :  { %624 = vset.pattern.permute.xlu1 %v766_v21 }
  0x4e   :  { %337 = vperm.xlu1 %624, %v816_v3   ;;  %633 = vset.pattern.permute.xlu0 %v775_v39 }
  0x4f   :  { %625 = vset.pattern.permute.xlu2 %v767_v22 }
  0x50   :  { %239 = vperm.xlu2 %625, %v816_v3  }
  0x56   :  { %627 = vset.pattern.permute.xlu1 %v768_v23 }
  0x57   :  { %347 = vperm.xlu1 %627, %v816_v3  }
  0x58   :  { %628 = vset.pattern.permute.xlu2 %v769_v24 }
  0x59   :  { %265 = vperm.xlu2 %628, %v816_v3  }
  0x5f   :  { %629 = vset.pattern.permute.xlu1 %v770_v25  ;;  %v372_v25 = vld [vmem:[#allocation8 + $0x40] sm:$0xff] }
  0x60   :  { %275 = vperm.xlu1 %629, %v816_v3   ;;  %398 = vmatpush.xpose.msra.mxu0 %v372_v25 }
  0x61   :  { %630 = vset.pattern.permute.xlu2 %v771_v26 }
  0x62   :  { %141 = vperm.xlu2 %630, %v816_v3  }
  0x68   :  { %635 = vset.pattern.permute.xlu1 %v778_v50 }
  0x6a   :  { %632 = vset.pattern.permute.xlu2 %v772_v27  ;;  %v95_v28 = vpop.permute.xlu2 %94  ;;  %v364_v27 = vld [vmem:[#allocation8] sm:$0xff] }
  0x6b   :  { %105 = vperm.xlu2 %632, %v816_v3   ;;  %v97_v52 = vmul.f32 %v95_v28, %v847_v32  ;;  %399 = vmatpush.xpose.msra.mxu0 %v364_v27 }
  0x73   :  { %634 = vset.pattern.permute.xlu2 %v774_v33 }
  0x74   :  { %v158_v30 = vpop.permute.xlu2 %157 }
  0x75   :  { %v160_v51 = vmul.f32 %v158_v30, %v847_v32  ;;  %v374_v30 = vld [vmem:[#allocation8 + $0x50] sm:$0xff] }
  0x76   :  { %438 = vmatpush.xpose.msra.mxu2 %v374_v30 }
  0x7d   :  { %v194_v31 = vpop.permute.xlu2 %193 }
  0x7e   :  { %v196_v55 = vmul.f32 %v194_v31, %v847_v32  ;;  %v366_v31 = vld [vmem:[#allocation8 + $0x10] sm:$0xff] }
  0x7f   :  { %439 = vmatpush.xpose.msra.mxu2 %v366_v31 }
  0x81   :  { %v84_v35 = vpop.permute.xlu1 %83 }
  0x82   :  { %v66_v34 = vpop.permute.xlu0 %65  ;;  %v86_v37 = vmul.f32 %v84_v35, %v847_v32 }
  0x83   :  { %v68_v36 = vmul.f32 %v66_v34, %v847_v32 }
  0x84   :  { %88 = vrot.lane.b32.xlu2 %v86_v37, %s745_s30 }
  0x85   :  { %70 = vst.msk [vmem:[#allocation2] sm:$0xff] %vm69_vm0, %v68_v36  ;;  %v375_v36 = vld [vmem:[#allocation8 + $0x58] sm:$0xff] }
  0x86   :  { %v204_v38 = vpop.permute.xlu2 %203  ;;  %458 = vmatpush.xpose.msra.mxu3 %v375_v36 }
  0x87   :  { %v206_v59 = vmul.f32 %v204_v38, %v847_v32  ;;  %v367_v38 = vld [vmem:[#allocation8 + $0x18] sm:$0xff] }
  0x8a   :  { %v148_v41 = vpop.permute.xlu1 %147  ;;  %459 = vmatpush.xpose.msra.mxu3 %v367_v38 }
  0x8b   :  { %v73_v40 = vpop.permute.xlu0 %72  ;;  %v150_v44 = vmul.f32 %v148_v41, %v847_v32 }
  0x8c   :  { %v75_v42 = vmul.f32 %v73_v40, %v847_v32 }
  0x8e   :  { %77 = vrot.lane.b32.xlu1 %v75_v42, %s776_s0  ;;  %v373_v42 = vld [vmem:[#allocation8 + $0x48] sm:$0xff] }
  0x8f   :  { %v292_v43 = vpop.permute.xlu2 %291  ;;  %418 = vmatpush.xpose.msra.mxu1 %v373_v42 }
  0x90   :  { %v294_v1 = vmul.f32 %v292_v43, %v847_v32 }
  0x93   :  { %v184_v46 = vpop.permute.xlu1 %183 }
  0x94   :  { %v168_v45 = vpop.permute.xlu0 %167  ;;  %v186_v48 = vmul.f32 %v184_v46, %v847_v32 }
  0x95   :  { %v170_v47 = vmul.f32 %v168_v45, %v847_v32  ;;  %v376_v45 = vld [vmem:[#allocation8 + $0x60] sm:$0xff] }
  0x96   :  { %152 = vrot.lane.b32.xlu1 %v150_v44, %s776_s0  ;;  %188 = vrot.lane.b32.xlu0 %v186_v48, %s776_s0  ;;  %v365_v44 = vld [vmem:[#allocation8 + $0x8] sm:$0xff] }
  0x97   :  { %172 = vrot.lane.b32.xlu2 %v170_v47, %s777_s2  ;;  %419 = vmatpush.xpose.msra.mxu1 %v365_v44 }
  0x98   :  { %v220_v49 = vpop.permute.xlu2 %219  ;;  %478 = vmatpush.xpose.msrb.mxu0 %v376_v45 }
  0x99   :  { %v222_v8 = vmul.f32 %v220_v49, %v847_v32  ;;  %v368_v49 = vld [vmem:[#allocation8 + $0x20] sm:$0xff] }
  0x9c   :  { %v112_v53 = vpop.permute.xlu1 %111  ;;  %479 = vmatpush.xpose.msrb.mxu0 %v368_v49 }
  0x9d   :  { %v114_v54 = vmul.f32 %v112_v53, %v847_v32  ;;  %v122_v58 = vpop.permute.xlu0 %121 }
  0x9e   :  { %162 = vrot.lane.b32.xlu1 %v160_v51, %s745_s30  ;;  %v124_v60 = vmul.f32 %v122_v58, %v847_v32 }
  0x9f   :  { %99 = vrot.lane.b32.xlu2 %v97_v52, %s777_s2  ;;  %116 = vrot.lane.b32.xlu0 %v114_v54, %s776_s0 }
  0xa1   :  { %v230_v56 = vpop.permute.xlu2 %229 }
  0xa2   :  { %v232_v5 = vmul.f32 %v230_v56, %v847_v32  ;;  %v378_v56 = vld [vmem:[#allocation8 + $0x70] sm:$0xff] }
  0xa3   :  { %518 = vmatpush.xpose.msrb.mxu2 %v378_v56 }
  0xa5   :  { %v132_v57 = vpop.permute.xlu1 %131 }
  0xa6   :  { %198 = vrot.lane.b32.xlu1 %v196_v55, %s745_s30  ;;  %v312_v0 = vpop.permute.xlu0 %311  ;;  %v134_v2 = vmul.f32 %v132_v57, %v847_v32 }
  0xa7   :  { %213 = vperm.xlu2 %634, %v816_v3   ;;  %285 = vperm.xlu0 %633, %v816_v3   ;;  %v314_v16 = vmul.f32 %v312_v0, %v847_v32  ;;  %v377_v0 = vld [vmem:[#allocation8 + $0x68] sm:$0xff] }
  0xa8   :  { %498 = vmatpush.xpose.msrb.mxu1 %v377_v0 }
  0xaa   :  { %v240_v61 = vpop.permute.xlu2 %239 }
  0xab   :  { %v242_v18 = vmul.f32 %v240_v61, %v847_v32 }
  0xae   :  { %208 = vrot.lane.b32.xlu1 %v206_v59, %s777_s2  ;;  %v302_v62 = vpop.permute.xlu1 %301  ;;  %v370_v59 = vld [vmem:[#allocation8 + $0x30] sm:$0xff] }
  0xaf   :  { %126 = vrot.lane.b32.xlu2 %v124_v60, %s745_s30  ;;  %636 = vset.pattern.permute.xlu0 %v779_v63  ;;  %v256_v7 = vpop.permute.xlu0 %255  ;;  %v304_v13 = vmul.f32 %v302_v62, %v847_v32 }
  0xb0   :  { %249 = vperm.xlu0 %636, %v816_v3   ;;  %v258_v9 = vmul.f32 %v256_v7, %v847_v32  ;;  %519 = vmatpush.xpose.msrb.mxu2 %v370_v59  ;;  %v379_v7 = vld [vmem:[#allocation8 + $0x78] sm:$0xff] }
  0xb1   :  { %538 = vmatpush.xpose.msrb.mxu3 %v379_v7 }
  0xb3   :  { %v266_v4 = vpop.permute.xlu2 %265 }
  0xb4   :  { %v268_v19 = vmul.f32 %v266_v4, %v847_v32 }
  0xb6   :  { %136 = vrot.lane.b32.xlu1 %v134_v2, %s777_s2  ;;  %v369_v2 = vld [vmem:[#allocation8 + $0x28] sm:$0xff] }
  0xb7   :  { %296 = vrot.lane.b32.xlu2 %v294_v1, %s776_s0  ;;  %v328_v6 = vpop.permute.xlu1 %327  ;;  %499 = vmatpush.xpose.msrb.mxu1 %v369_v2 }
  0xb8   :  { %234 = vrot.lane.b32.xlu0 %v232_v5, %s745_s30  ;;  %v330_v14 = vmul.f32 %v328_v6, %v847_v32  ;;  %v178_v24 = vpop.permute.xlu0 %177 }
  0xb9   :  { %637 = vset.pattern.permute.xlu0 %v768_v23  ;;  %v180_v26 = vmul.f32 %v178_v24, %v847_v32 }
  0xbb   :  { %181 = vst.msk [vmem:[#allocation2 + $0x18] sm:$0xff] %vm69_vm0, %v180_v26 }
  0xbc   :  { %v142_v10 = vpop.permute.xlu2 %141 }
  0xbd   :  { %v144_v11 = vmul.f32 %v142_v10, %v847_v32 }
  0xbe   :  { %321 = vperm.xlu1 %635, %v816_v3  }
  0xbf   :  { %224 = vrot.lane.b32.xlu2 %v222_v8, %s776_s0  ;;  %145 = vst.msk [vmem:[#allocation2 + $0x10] sm:$0xff] %vm69_vm0, %v144_v11  ;;  %v371_v11 = vld [vmem:[#allocation8 + $0x38] sm:$0xff] }
  0xc0   :  { %v338_v12 = vpop.permute.xlu1 %337  ;;  %260 = vrot.lane.b32.xlu0 %v258_v9, %s776_s0  ;;  %539 = vmatpush.xpose.msrb.mxu3 %v371_v11 }
  0xc1   :  { %v340_v21 = vmul.f32 %v338_v12, %v847_v32 }
  0xc5   :  { %v106_v15 = vpop.permute.xlu2 %105 }
  0xc6   :  { %306 = vrot.lane.b32.xlu1 %v304_v13, %s745_s30  ;;  %v108_v3 = vmul.f32 %v106_v15, %v847_v32 }
  0xc7   :  { %332 = vrot.lane.b32.xlu2 %v330_v14, %s776_s0 }
  0xc8   :  { %109 = vst.msk [vmem:[#allocation2 + $0x8] sm:$0xff] %vm69_vm0, %v108_v3 }
  0xc9   :  { %v348_v17 = vpop.permute.xlu1 %347 }
  0xca   :  { %v350_v23 = vmul.f32 %v348_v17, %v847_v32 }
  0xce   :  { %316 = vrot.lane.b32.xlu1 %v314_v16, %s777_s2 }
  0xcf   :  { %244 = vrot.lane.b32.xlu2 %v242_v18, %s777_s2  ;;  %v638_v18 = vld [vmem:[%s951_s3] ss:$0 sm:$0xff]  ;;  %s554_s3 = sshll.u32 %s952_s4, 4  ;;  %s555_s3 = int_to_ptr.hbm [resolvable:$true] %s554_s3 }
  0xd2   :  { %v276_v20 = vpop.permute.xlu1 %275 }
  0xd3   :  { %v278_v22 = vmul.f32 %v276_v20, %v847_v32 }
  0xd5   :  { %280 = vrot.lane.b32.xlu0 %v278_v22, %s777_s2 }
  0xd6   :  { %342 = vrot.lane.b32.xlu1 %v340_v21, %s745_s30 }
  0xd7   :  { %270 = vrot.lane.b32.xlu2 %v268_v19, %s745_s30 }
  0xde   :  { %352 = vrot.lane.b32.xlu1 %v350_v23, %s777_s2  ;;  %v89_v28 = vpop.permute.xlu2 %88 }
  0xf1   :  { %v173_v29 = vpop.permute.xlu2 %172 }
  0xf9   :  { %v100_v33 = vpop.permute.xlu2 %99 }
 0x100   :  { %v78_v34 = vpop.permute.xlu1 %77 }
 0x101   :  { %81 = vst.msk [vmem:[#allocation2] sm:$0xff] %vm80_vm1, %v78_v34  ;;  %v214_v35 = vpop.permute.xlu2 %213 }
 0x102   :  { %92 = vst.msk [vmem:[#allocation2] sm:$0xff] %vm91_vm2, %v89_v28  ;;  %v216_v37 = vmul.f32 %v214_v35, %v847_v32 }
 0x103   :  { %103 = vst.msk [vmem:[#allocation2] sm:$0xff] %vm102_vm3, %v100_v33 }
 0x104   :  { %217 = vst.msk [vmem:[#allocation2 + $0x20] sm:$0xff] %vm69_vm0, %v216_v37 }
 0x108   :  { %v153_v39 = vpop.permute.xlu1 %152  ;;  %v189_v41 = vpop.permute.xlu0 %188 }
 0x109   :  { %155 = vst.msk [vmem:[#allocation2 + $0x10] sm:$0xff] %vm80_vm1, %v153_v39  ;;  %v127_v40 = vpop.permute.xlu2 %126 }
 0x10a   :  { %191 = vst.msk [vmem:[#allocation2 + $0x18] sm:$0xff] %vm80_vm1, %v189_v41  ;;  %v356_v43 = vld [vmem:[#allocation2] sm:$0xff] }
 0x10b   :  { %400 = vmatmul.f32.vlgmr.msra.gmra.mxu0 %v356_v43 }
 0x110   :  { %v163_v46 = vpop.permute.xlu1 %162 }
 0x111   :  { %165 = vst.msk [vmem:[#allocation2 + $0x10] sm:$0xff] %vm91_vm2, %v163_v46  ;;  %v297_v47 = vpop.permute.xlu2 %296  ;;  %v117_v48 = vpop.permute.xlu0 %116 }
 0x112   :  { %175 = vst.msk [vmem:[#allocation2 + $0x10] sm:$0xff] %vm102_vm3, %v173_v29 }
 0x113   :  { %119 = vst.msk [vmem:[#allocation2 + $0x8] sm:$0xff] %vm80_vm1, %v117_v48 }
 0x114   :  { %129 = vst.msk [vmem:[#allocation2 + $0x8] sm:$0xff] %vm91_vm2, %v127_v40 }
 0x118   :  { %v199_v50 = vpop.permute.xlu1 %198 }
 0x119   :  { %201 = vst.msk [vmem:[#allocation2 + $0x18] sm:$0xff] %vm91_vm2, %v199_v50  ;;  %v225_v51 = vpop.permute.xlu2 %224  ;;  %v358_v52 = vld [vmem:[#allocation2 + $0x10] sm:$0xff]  ;;  %v286_v53 = vpop.permute.xlu0 %285 }
 0x11a   :  { %227 = vst.msk [vmem:[#allocation2 + $0x20] sm:$0xff] %vm80_vm1, %v225_v51  ;;  %440 = vmatmul.f32.vlgmr.msra.gmra.mxu2 %v358_v52  ;;  %v288_v54 = vmul.f32 %v286_v53, %v847_v32 }
 0x11c   :  { %289 = vst.msk [vmem:[#allocation2 + $0x30] sm:$0xff] %vm69_vm0, %v288_v54 }
 0x11d   :  { %299 = vst.msk [vmem:[#allocation2 + $0x30] sm:$0xff] %vm80_vm1, %v297_v47 }
 0x120   :  { %v209_v55 = vpop.permute.xlu1 %208 }
 0x121   :  { %211 = vst.msk [vmem:[#allocation2 + $0x18] sm:$0xff] %vm102_vm3, %v209_v55  ;;  %v333_v57 = vpop.permute.xlu2 %332 }
 0x122   :  { %v250_v58 = vpop.permute.xlu0 %249 }
 0x123   :  { %v252_v60 = vmul.f32 %v250_v58, %v847_v32 }
 0x125   :  { %253 = vst.msk [vmem:[#allocation2 + $0x28] sm:$0xff] %vm69_vm0, %v252_v60 }
 0x128   :  { %v137_v61 = vpop.permute.xlu1 %136  ;;  %v359_v62 = vld [vmem:[#allocation2 + $0x18] sm:$0xff] }
 0x129   :  { %139 = vst.msk [vmem:[#allocation2 + $0x8] sm:$0xff] %vm102_vm3, %v137_v61  ;;  %460 = vmatmul.f32.vlgmr.msra.gmra.mxu3 %v359_v62  ;;  %v245_v63 = vpop.permute.xlu2 %244 }
 0x12a   :  { %v235_v1 = vpop.permute.xlu0 %234 }
 0x12b   :  { %237 = vst.msk [vmem:[#allocation2 + $0x20] sm:$0xff] %vm91_vm2, %v235_v1 }
 0x12c   :  { %247 = vst.msk [vmem:[#allocation2 + $0x20] sm:$0xff] %vm102_vm3, %v245_v63 }
 0x130   :  { %v322_v4 = vpop.permute.xlu1 %321  ;;  %v357_v5 = vld [vmem:[#allocation2 + $0x8] sm:$0xff] }
 0x131   :  { %v324_v6 = vmul.f32 %v322_v4, %v847_v32  ;;  %420 = vmatmul.f32.vlgmr.msra.gmra.mxu1 %v357_v5  ;;  %v271_v8 = vpop.permute.xlu2 %270 }
 0x132   :  { %v261_v10 = vpop.permute.xlu0 %260 }
 0x133   :  { %325 = vst.msk [vmem:[#allocation2 + $0x38] sm:$0xff] %vm69_vm0, %v324_v6  ;;  %v360_v9 = vld [vmem:[#allocation2 + $0x20] sm:$0xff] }
 0x134   :  { %335 = vst.msk [vmem:[#allocation2 + $0x38] sm:$0xff] %vm80_vm1, %v333_v57  ;;  %480 = vmatmul.f32.vlgmr.msrb.gmra.mxu0 %v360_v9 }
 0x135   :  { %263 = vst.msk [vmem:[#allocation2 + $0x28] sm:$0xff] %vm80_vm1, %v261_v10 }
 0x136   :  { %273 = vst.msk [vmem:[#allocation2 + $0x28] sm:$0xff] %vm91_vm2, %v271_v8 }
 0x138   :  { %v307_v12 = vpop.permute.xlu1 %306 }
 0x139   :  { %309 = vst.msk [vmem:[#allocation2 + $0x30] sm:$0xff] %vm91_vm2, %v307_v12 }
 0x140   :  { %v317_v32 = vpop.permute.xlu1 %316 }
 0x141   :  { %319 = vst.msk [vmem:[#allocation2 + $0x30] sm:$0xff] %vm102_vm3, %v317_v32 }
 0x147   :  { %v281_v14 = vpop.permute.xlu0 %280 }
 0x148   :  { %v343_v13 = vpop.permute.xlu1 %342  ;;  %v362_v15 = vld [vmem:[#allocation2 + $0x30] sm:$0xff]  ;;  %283 = vst.msk [vmem:[#allocation2 + $0x28] sm:$0xff] %vm102_vm3, %v281_v14 }
 0x149   :  { %345 = vst.msk [vmem:[#allocation2 + $0x38] sm:$0xff] %vm91_vm2, %v343_v13  ;;  %520 = vmatmul.f32.vlgmr.msrb.gmra.mxu2 %v362_v15 }
 0x14f   :  { %v361_v16 = vld [vmem:[#allocation2 + $0x28] sm:$0xff] }
 0x150   :  { %v353_v3 = vpop.permute.xlu1 %352  ;;  %500 = vmatmul.f32.vlgmr.msrb.gmra.mxu1 %v361_v16 }
 0x151   :  { %355 = vst.msk [vmem:[#allocation2 + $0x38] sm:$0xff] %vm102_vm3, %v353_v3 }
 0x158   :  { %v363_v17 = vld [vmem:[#allocation2 + $0x38] sm:$0xff] }
 0x159   :  { %540 = vmatmul.f32.vlgmr.msrb.gmra.mxu3 %v363_v17 }
 0x188   :  { %v401_v19 = vpop.f32.mrf.mxu0 }
 0x189   :  { %v402_v21 = vadd.f32 %v638_v18, %v401_v19 }
 0x19d   :  { %v441_v23 = vpop.f32.mrf.mxu2 }
 0x1ac   :  { %v461_v25 = vpop.f32.mrf.mxu3 }
 0x1ae   :  { %v421_v20 = vpop.f32.mrf.mxu1 }
 0x1af   :  { %v422_v22 = vadd.f32 %v421_v20, %v402_v21 }
 0x1b1   :  { %v442_v24 = vadd.f32 %v441_v23, %v422_v22  ;;  %v481_v27 = vpop.f32.mrf.mxu0 }
 0x1b3   :  { %v462_v26 = vadd.f32 %v461_v25, %v442_v24 }
 0x1b5   :  { %v482_v29 = vadd.f32 %v481_v27, %v462_v26 }
 0x1cc   :  { %v521_v31 = vpop.f32.mrf.mxu2 }
 0x1cd   :  { %v501_v28 = vpop.f32.mrf.mxu1 }
 0x1ce   :  { %v502_v30 = vadd.f32 %v501_v28, %v482_v29 }
 0x1d0   :  { %v522_v33 = vadd.f32 %v521_v31, %v502_v30 }
 0x1dc   :  { %v541_v34 = vpop.f32.mrf.mxu3 }
 0x1dd   :  { %v542_v35 = vadd.f32 %v541_v34, %v522_v33 }
 0x1df   :  { %v544_v36 = vmax.f32 %v542_v35, 0.0 }
 0x1e1   :  { %546 = vst.msk [vmem:[#allocation9] sm:$0xff] %vm545_vm4, %v544_v36 }
 0x1e2   :  { %557 = dma.vmem_to_hbm [thread:$0]  %s553_s8, 128, %s555_s3, [#allocation5]  }
 0x1e3   :  { %739 = dma.done.wait [#allocation5], 128  }
 0x1e4   :  { %740 = vsyncadd [#allocation5], 4294967168 }
 0x1e5   :  { %562 = vsyncpa [#allocation4], 1 }
 0x1e6   :  { %563 = vsyncpa [#allocation7], 1 }
 0x1e7   :  { %564 = vsyncpa [#allocation5], 1 }

</bundles_post_ra>
